<compile_context>
chip_gen: v7x
topology: tpu7x:2x2x1
jax: 0.10.0
libtpu: 0.0.40
codegen_flags: <defaults>
</compile_context>

<pallas_src>
import jax
import jax.numpy as jnp
from jax import lax
from jax.experimental import pallas as pl
from jax.experimental.pallas import tpu as pltpu

LANE = 128


def _vmem_capacity_bytes():
    """Physical VMEM per TensorCore; conservative v7x default if unknown."""
    try:
        info = pltpu.get_tpu_info()
        cap = getattr(info, "vmem_capacity_bytes", None)
        if cap:
            return int(cap)
    except Exception:
        pass
    return 64 << 20


# ---------------------------------------------------------------------------
# Fused single-pass kernel: pool + MLP + sigmoid + multiply, one batch / step.
# ---------------------------------------------------------------------------
def _make_fused_kernel(hw):
    inv_hw = 1.0 / float(hw)

    def kernel(x_ref, w1_ref, w2_ref, o_ref):
        # x_ref: (1, C, HW) full extent (no padding, no mask needed).
        x32 = x_ref[0].astype(jnp.float32)                          # (C, HW)
        avg = jnp.sum(x32, axis=-1, keepdims=True) * inv_hw         # (C, 1)
        mx = jnp.max(x32, axis=-1, keepdims=True)                   # (C, 1)
        p = jnp.concatenate([avg, mx], axis=-1)                     # (C, 2)
        w1 = w1_ref[...].astype(jnp.float32)                        # (Cr, C)
        w2 = w2_ref[...].astype(jnp.float32)                        # (C, Cr)
        # Both pooling branches through the shared MLP in one (tiny) matmul.
        h = jnp.maximum(
            jnp.dot(w1, p, preferred_element_type=jnp.float32,
                    precision=lax.Precision.HIGHEST), 0.0)          # (Cr, 2)
        logits = jnp.dot(w2, h, preferred_element_type=jnp.float32,
                         precision=lax.Precision.HIGHEST)           # (C, 2)
        gate = jax.nn.sigmoid(logits[:, 0:1] + logits[:, 1:2])      # (C, 1)
        # Multiply in f32 (matches the reference rounding), cast once.
        o_ref[0] = (x32 * gate).astype(o_ref.dtype)

    return kernel


# ---------------------------------------------------------------------------
# Two-pass path, pass 1: streamed pooled stats (sum->avg, max) per channel.
# ---------------------------------------------------------------------------
def _make_stats_kernel(thw, hw_true, nt):
    nchunks = thw // LANE
    last_tile_start = (nt - 1) * thw
    valid_in_last = hw_true - last_tile_start            # in (0, thw]
    last_full = max(0, valid_in_last // LANE)            # fully-valid chunks
    last_total = -(-valid_in_last // LANE)               # chunks with any data
    last_is_full = last_full == nchunks
    inv_hw = 1.0 / float(hw_true)

    def kernel(x_ref, stats_ref, sum_acc, max_acc):
        # x_ref    : (1, C, thw)  one spatial tile of one batch element
        # stats_ref: (1, C, 2)    [avg | max] pooled stats (f32)
        # sum_acc / max_acc: (C, LANE) f32 cross-tile partial accumulators
        t = pl.program_id(1)
        C = sum_acc.shape[0]

        @pl.when(t == 0)
        def _():
            sum_acc[...] = jnp.zeros_like(sum_acc)
            max_acc[...] = jnp.full_like(max_acc, -jnp.inf)

        def accumulate(start_chunk, stop_chunk, masked):
            # Static chunk range; accumulate in registers (fori_loop carry)
            # and touch the VMEM scratch exactly once at the end.
            if stop_chunk <= start_chunk:
                return
            n = stop_chunk - start_chunk
            # Bound unroll by vreg pressure (each iter holds ~C/8 chunk vregs).
            unroll = max(1, min(n, 8, 512 // max(C, 8)))

            def body(i, carry):
                s_v, m_v = carry
                start = pl.multiple_of((start_chunk + i) * LANE, LANE)
                chunk = x_ref[0, :, pl.ds(start, LANE)].astype(jnp.float32)
                if masked:
                    # Only the tail chunk(s) of the global last tile are masked.
                    col = (last_tile_start + start
                           + lax.broadcasted_iota(jnp.int32, (C, LANE), 1))
                    valid = col < hw_true
                    s_v = s_v + jnp.where(valid, chunk, 0.0)
                    m_v = jnp.maximum(m_v, jnp.where(valid, chunk, -jnp.inf))
                else:
                    s_v = s_v + chunk
                    m_v = jnp.maximum(m_v, chunk)
                return (s_v, m_v)

            init = (jnp.zeros((C, LANE), jnp.float32),
                    jnp.full((C, LANE), -jnp.inf, jnp.float32))
            s_v, m_v = lax.fori_loop(0, n, body, init, unroll=unroll)
            sum_acc[...] += s_v
            max_acc[...] = jnp.maximum(max_acc[...], m_v)

        if last_is_full:
            # Every tile is fully valid: one unmasked loop, no branches.
            accumulate(0, nchunks, masked=False)
        else:
            @pl.when(t < nt - 1)
            def _():
                accumulate(0, nchunks, masked=False)

            @pl.when(t == nt - 1)
            def _():
                accumulate(0, last_full, masked=False)
                accumulate(last_full, last_total, masked=True)

        @pl.when(t == nt - 1)
        def _():
            avg = jnp.sum(sum_acc[...], axis=-1, keepdims=True) * inv_hw  # (C,1)
            mx = jnp.max(max_acc[...], axis=-1, keepdims=True)            # (C,1)
            stats_ref[...] = jnp.concatenate([avg, mx], axis=-1)[None]    # (1,C,2)

    return kernel


# ---------------------------------------------------------------------------
# Two-pass path, pass 2: apply the per-channel gate to streamed x tiles.
# ---------------------------------------------------------------------------
def _apply_kernel(gate_ref, x_ref, o_ref):
    # gate_ref: (1, C, 1) f32;  x_ref / o_ref: (1, C, thw)
    xf = x_ref[...].astype(jnp.float32)
    o_ref[...] = (xf * gate_ref[...]).astype(o_ref.dtype)


# ---------------------------------------------------------------------------
# Wrapper
# ---------------------------------------------------------------------------
def channel_attention(x, w1, w2, *, fused=None):
    """CBAM channel attention.  x: (B, C, H, W); w1: (C//r, C); w2: (C, C//r)."""
    B, C, H, W = x.shape
    Cr = w1.shape[0]
    HW = H * W
    itemsize = jnp.dtype(x.dtype).itemsize
    x3 = x.reshape(B, C, HW)                 # free (bitcast) reshape

    vmem_cap = _vmem_capacity_bytes()

    # --- fused / two-pass dispatch ------------------------------------------
    slab_bytes = C * HW * itemsize
    # 2x(in+out) double-buffered slabs + an f32 working copy + margin.
    est_fused = 4 * slab_bytes + C * HW * 4 + (2 << 20)
    fused_budget = (40 << 20) if vmem_cap > (64 << 20) else (20 << 20)
    use_fused = fused if fused is not None else (est_fused <= fused_budget)
    if HW < LANE:
        use_fused = True                      # tiny spatial extent: one block

    if use_fused:
        out = pl.pallas_call(
            _make_fused_kernel(HW),
            out_shape=jax.ShapeDtypeStruct((B, C, HW), x.dtype),
            grid=(B,),
            in_specs=[
                pl.BlockSpec((1, C, HW), lambda b: (b, 0, 0)),
                pl.BlockSpec((Cr, C), lambda b: (0, 0)),
                pl.BlockSpec((C, Cr), lambda b: (0, 0)),
            ],
            out_specs=pl.BlockSpec((1, C, HW), lambda b: (b, 0, 0)),
            compiler_params=pltpu.CompilerParams(
                dimension_semantics=("parallel",),
                vmem_limit_bytes=int(max(16 << 20, est_fused + (4 << 20))),
            ),
        )(x3, w1, w2)
        return out.reshape(B, C, H, W)

    # --- two-pass streaming path (HW >= LANE guaranteed here) ----------------
    # Lane-dense spatial tile; larger on v5e/v6e (128 MiB VMEM), smaller on v7x.
    tile_budget = (8 << 20) if vmem_cap > (64 << 20) else (4 << 20)
    thw = max(LANE, (tile_budget // max(1, C * itemsize)) // LANE * LANE)
    thw = min(thw, (HW // LANE) * LANE)       # block dim never exceeds HW
    nt = pl.cdiv(HW, thw)                     # ragged last tile allowed
    block_bytes = C * thw * itemsize

    # Pass 1: pooled avg/max stats, (B, C, 2) f32.  No MLP in the hot loop.
    stats = pl.pallas_call(
        _make_stats_kernel(thw, HW, nt),
        out_shape=jax.ShapeDtypeStruct((B, C, 2), jnp.float32),
        grid=(B, nt),
        in_specs=[pl.BlockSpec((1, C, thw), lambda b, t: (b, 0, t))],
        out_specs=pl.BlockSpec((1, C, 2), lambda b, t: (b, 0, 0)),
        scratch_shapes=[
            pltpu.VMEM((C, LANE), jnp.float32),   # sum partials
            pltpu.VMEM((C, LANE), jnp.float32),   # max partials
        ],
        compiler_params=pltpu.CompilerParams(
            dimension_semantics=("parallel", "arbitrary"),
            vmem_limit_bytes=int(max(16 << 20,
                                     2 * block_bytes + 2 * C * LANE * 4 + (4 << 20))),
        ),
    )(x3)

    # Tiny shared MLP + sigmoid, batched across B in plain XLA.
    w1f = w1.astype(jnp.float32)
    w2f = w2.astype(jnp.float32)

    def mlp(p):  # p: (B, C)
        h = jnp.maximum(jnp.dot(p, w1f.T, precision=lax.Precision.HIGHEST), 0.0)
        return jnp.dot(h, w2f.T, precision=lax.Precision.HIGHEST)

    gate = jax.nn.sigmoid(mlp(stats[..., 0]) + mlp(stats[..., 1]))[..., None]  # (B,C,1)

    # Pass 2: stream x and apply the gate (ragged last tile -> masked store).
    out = pl.pallas_call(
        _apply_kernel,
        out_shape=jax.ShapeDtypeStruct((B, C, HW), x.dtype),
        grid=(B, nt),
        in_specs=[
            pl.BlockSpec((1, C, 1), lambda b, t: (b, 0, 0)),
            pl.BlockSpec((1, C, thw), lambda b, t: (b, 0, t)),
        ],
        out_specs=pl.BlockSpec((1, C, thw), lambda b, t: (b, 0, t)),
        compiler_params=pltpu.CompilerParams(
            dimension_semantics=("parallel", "parallel"),
            vmem_limit_bytes=int(max(16 << 20, 4 * block_bytes + (4 << 20))),
        ),
    )(gate, x3)

    return out.reshape(B, C, H, W)


def channel_attention_ref(x, w1, w2):
    """Pure-JAX reference mirroring the PyTorch forward."""
    xf = x.astype(jnp.float32)
    avg_p = jnp.mean(xf, axis=(2, 3))             # (B, C)
    max_p = jnp.max(xf, axis=(2, 3))              # (B, C)

    def mlp(p):
        h = jnp.maximum(jnp.dot(p, w1.T, precision=lax.Precision.HIGHEST), 0.0)
        return jnp.dot(h, w2.T, precision=lax.Precision.HIGHEST)

    gate = jax.nn.sigmoid(mlp(avg_p) + mlp(max_p))
    return (xf * gate[:, :, None, None]).astype(x.dtype)


if __name__ == "__main__":
    key = jax.random.PRNGKey(0)
    kx, k1, k2, kx2, kx3 = jax.random.split(key, 5)

    B, C, reduction = 2, 16, 8
    Cr = C // reduction

    w1 = jax.random.normal(k1, (Cr, C), dtype=jnp.float32) * 0.1   # fc1 (1x1 conv)
    w2 = jax.random.normal(k2, (C, Cr), dtype=jnp.float32) * 0.1   # fc2 (1x1 conv)

    # Fused single-pass path, lane-aligned spatial size.
    x = jax.random.normal(kx, (B, C, 16, 16), dtype=jnp.float32)
    out = jax.block_until_ready(channel_attention(x, w1, w2))
    ref = channel_attention_ref(x, w1, w2)
    assert out.shape == x.shape
    assert jnp.allclose(out, ref, atol=2e-3, rtol=2e-3), "mismatch (fused 16x16)"

    # Fused path with a non-128-multiple spatial size (full-extent block, no pad).
    x2 = jax.random.normal(kx2, (B, C, 7, 7), dtype=jnp.float32)
    out2 = jax.block_until_ready(channel_attention(x2, w1, w2))
    ref2 = channel_attention_ref(x2, w1, w2)
    assert out2.shape == x2.shape
    assert jnp.allclose(out2, ref2, atol=2e-3, rtol=2e-3), "mismatch (fused 7x7)"

    # Forced two-pass path (exercises the streamed reduce + apply kernels).
    out3 = jax.block_until_ready(channel_attention(x, w1, w2, fused=False))
    assert jnp.allclose(out3, ref, atol=2e-3, rtol=2e-3), "mismatch (two-pass 16x16)"

    # Two-pass with a ragged last tile (HW=169, thw=128): masked tail chunk in
    # pass 1 and a masked partial-block store in pass 2 — no HBM pad/slice.
    xr = jax.random.normal(kx3, (B, C, 13, 13), dtype=jnp.float32)
    out4 = jax.block_until_ready(channel_attention(xr, w1, w2, fused=False))
    ref4 = channel_attention_ref(xr, w1, w2)
    assert out4.shape == xr.shape
    assert jnp.allclose(out4, ref4, atol=2e-3, rtol=2e-3), "mismatch (two-pass 13x13)"

    print("KERNEL_OK")
</pallas_src>

<mosaic_0001>
module attributes {stable_mosaic.version = 11 : i64} {
  func.func @kernel(%arg0: i32, %arg1: memref<1x16x256xf32, #tpu.memory_space<vmem>>, %arg2: memref<2x16xf32, #tpu.memory_space<vmem>>, %arg3: memref<16x2xf32, #tpu.memory_space<vmem>>, %arg4: memref<1x16x256xf32, #tpu.memory_space<vmem>>) attributes {dimension_semantics = [#tpu.dimension_semantics<parallel>], iteration_bounds = array<i64: 2>, scalar_prefetch = 0 : i64, scratch_operands = 0 : i64, tpu.core_type = #tpu.core_type<tc>, window_params = [{transform_indices = @transform_0, window_bounds = array<i64: 1, 16, 256>}, {pipeline_mode = #tpu.pipeline_mode<synchronous>, transform_indices = @transform_1, window_bounds = array<i64: 2, 16>}, {pipeline_mode = #tpu.pipeline_mode<synchronous>, transform_indices = @transform_2, window_bounds = array<i64: 16, 2>}, {transform_indices = @transform_3, window_bounds = array<i64: 1, 16, 256>}]} {
    %c0 = arith.constant 0 : index
    %c0_0 = arith.constant 0 : index
    %c0_1 = arith.constant 0 : index
    %0 = vector.load %arg1[%c0, %c0_0, %c0_1] : memref<1x16x256xf32, #tpu.memory_space<vmem>>, vector<1x16x256xf32>
    %1 = vector.shape_cast %0 : vector<1x16x256xf32> to vector<16x256xf32>
    %cst = arith.constant dense<0.000000e+00> : vector<16xf32>
    %2 = vector.multi_reduction <add>, %1, %cst [1] : vector<16x256xf32> to vector<16xf32>
    %3 = vector.shape_cast %2 : vector<16xf32> to vector<16x1xf32>
    %cst_2 = arith.constant 3.906250e-03 : f32
    %4 = vector.broadcast %cst_2 : f32 to vector<16x1xf32>
    %5 = arith.mulf %3, %4 : vector<16x1xf32>
    %cst_3 = arith.constant dense<0xFF800000> : vector<16xf32>
    %6 = vector.multi_reduction <maximumf>, %1, %cst_3 [1] : vector<16x256xf32> to vector<16xf32>
    %7 = vector.shape_cast %6 : vector<16xf32> to vector<16x1xf32>
    %8 = tpu.concatenate %5, %7 in 1 : vector<16x1xf32>, vector<16x1xf32> -> vector<16x2xf32>
    %c0_4 = arith.constant 0 : index
    %c0_5 = arith.constant 0 : index
    %9 = vector.load %arg2[%c0_4, %c0_5] : memref<2x16xf32, #tpu.memory_space<vmem>>, vector<2x16xf32>
    %c0_6 = arith.constant 0 : index
    %c0_7 = arith.constant 0 : index
    %10 = vector.load %arg3[%c0_6, %c0_7] : memref<16x2xf32, #tpu.memory_space<vmem>>, vector<16x2xf32>
    %cst_8 = arith.constant dense<0.000000e+00> : vector<2x2xf32>
    %11 = tpu.matmul %9, %8, %cst_8 {dimension_numbers = #tpu.dot_dimension_numbers<[1], [0], [0], [1], [0, 0, 1, 1], [], []>, precision = #tpu.contract_precision<fp32>} : vector<2x16xf32>, vector<16x2xf32>, vector<2x2xf32> -> vector<2x2xf32>
    %cst_9 = arith.constant 0.000000e+00 : f32
    %12 = vector.broadcast %cst_9 : f32 to vector<2x2xf32>
    %13 = arith.maximumf %11, %12 : vector<2x2xf32>
    %cst_10 = arith.constant dense<0.000000e+00> : vector<16x2xf32>
    %14 = tpu.matmul %10, %13, %cst_10 {dimension_numbers = #tpu.dot_dimension_numbers<[1], [0], [0], [1], [0, 0, 1, 1], [], []>, precision = #tpu.contract_precision<fp32>} : vector<16x2xf32>, vector<2x2xf32>, vector<16x2xf32> -> vector<16x2xf32>
    %15 = vector.extract_strided_slice %14 {offsets = [0, 0], sizes = [16, 1], strides = [1, 1]} : vector<16x2xf32> to vector<16x1xf32>
    %16 = vector.extract_strided_slice %14 {offsets = [0, 1], sizes = [16, 1], strides = [1, 1]} : vector<16x2xf32> to vector<16x1xf32>
    %17 = arith.addf %15, %16 : vector<16x1xf32>
    %18 = arith.negf %17 : vector<16x1xf32>
    %19 = math.exp %18 : vector<16x1xf32>
    %cst_11 = arith.constant 1.000000e+00 : f32
    %20 = vector.broadcast %cst_11 : f32 to vector<16x1xf32>
    %21 = arith.addf %20, %19 : vector<16x1xf32>
    %22 = arith.divf %20, %21 : vector<16x1xf32>
    %23 = vector.broadcast %22 : vector<16x1xf32> to vector<16x256xf32>
    %24 = arith.mulf %1, %23 : vector<16x256xf32>
    %c0_12 = arith.constant 0 : index
    %c0_13 = arith.constant 0 : index
    %c0_14 = arith.constant 0 : index
    %25 = vector.load %arg4[%c0_12, %c0_13, %c0_14] : memref<1x16x256xf32, #tpu.memory_space<vmem>>, vector<1x16x256xf32>
    %26 = vector.shape_cast %25 : vector<1x16x256xf32> to vector<16x256xf32>
    %27 = vector.shape_cast %24 : vector<16x256xf32> to vector<1x16x256xf32>
    tpu.vector_store %arg4[%c0_12, %c0_13, %c0_14], %27 {strides = array<i32>} : memref<1x16x256xf32, #tpu.memory_space<vmem>>, vector<1x16x256xf32>,
    return
  }
  func.func @transform_0(%arg0: i32) -> (i32, i32, i32) {
    %c0_i32 = arith.constant 0 : i32
    %c0_i32_0 = arith.constant 0 : i32
    %c0_i32_1 = arith.constant 0 : i32
    return %arg0, %c0_i32, %c0_i32_0 : i32, i32, i32
  }
  func.func @transform_1(%arg0: i32) -> (i32, i32) {
    %c0_i32 = arith.constant 0 : i32
    %c0_i32_0 = arith.constant 0 : i32
    %c0_i32_1 = arith.constant 0 : i32
    return %c0_i32, %c0_i32_0 : i32, i32
  }
  func.func @transform_2(%arg0: i32) -> (i32, i32) {
    %c0_i32 = arith.constant 0 : i32
    %c0_i32_0 = arith.constant 0 : i32
    %c0_i32_1 = arith.constant 0 : i32
    return %c0_i32, %c0_i32_0 : i32, i32
  }
  func.func @transform_3(%arg0: i32) -> (i32, i32, i32) {
    %c0_i32 = arith.constant 0 : i32
    %c0_i32_0 = arith.constant 0 : i32
    %c0_i32_1 = arith.constant 0 : i32
    return %arg0, %c0_i32, %c0_i32_0 : i32, i32, i32
  }
}

</mosaic_0001>

<bundles_post_ra>
// kernel: tpu_custom_call.1
= control target key start
LH: loop header
LB: loop body
LE: loop exit
PB: predicated region body
PF: predicated region fallthrough
CT: control target
= control target key end

     0   :  { %8 = vsyncpa [#allocation3], 0  ;;  %s1863_s0 = inlined_call_operand.hbm [shape: f32[2,16,256], index: 0, kind: input, shape index: {}]   ;;  %s1864_s1 = inlined_call_operand.vmem [shape: f32[2,16], index: 1, kind: input, shape index: {}]   ;;  %s1865_s2 = inlined_call_operand.vmem [shape: f32[16,2], index: 2, kind: input, shape index: {}]   ;;  %s1866_s3 = inlined_call_operand.hbm [shape: f32[2,16,256], index: 3, kind: output, shape index: {}]  }
   0x1   :  { %10 = vsyncpa [#allocation3 + $0x1], 0 }
   0x2   :  { %11 = vsyncpa [#allocation4], 0 }
   0x3   :  { %13 = vsyncpa [#allocation4 + $0x1], 0  ;;  %s1662_s12 = smov 0   ;;  %s1664_s13 = smov 0  }
   0x4   :  { %s1666_s14 = smov 0   ;;  %s1668_s15 = smov 0  }
   0x5 LB: > { %s1683_s16 = sadd.s32 4294967295, %s1629_s15   ;;  %s1304_s17 = sadd.s32 4294967294, %s1629_s15   ;;  %s1629_s15 = sphi %s1668_s15, %s1879_s15   ;;  %s1625_s14 = sphi %s1666_s14, %s1878_s14   ;;  %s1621_s13 = sphi %s1664_s13, %s1877_s13   ;;  %s1617_s12 = sphi %s1662_s12, %s1876_s12  }
   0x6   : > { %s1687_s18 = sadd.s32 1, %s1629_s15   ;;  %s26_s19 = sadd.s32 1, %s1625_s14 }
   0x7   : > { %s23_s20 = ssub.s32 %s1629_s15, %s1687_s18  ;;  %p33_p0 = scmp.ne.s32.totalorder %s1625_s14, %s1621_s13 }
   0x8   : > { %p24_p1 = scmp.eq.s32.totalorder %s23_s20, 0  ;;  %p34_p2 = scmp.eq.s32.totalorder %s1629_s15, 0 }
   0x9   : > { %p39_p3 = scmp.ne.s32.totalorder %s1621_s13, %s1617_s12  ;;  %p40_p4 = scmp.eq.s32.totalorder %s1683_s16, 0 }
   0xa   : > { %s1699_s21 = scalar_select %p24_p1, %s1625_s14, %s26_s19  }
   0xb   : > { %p1701_p5 = por %p34_p2, %p33_p0  ;;  %p1705_p6 = por %p40_p4, %p39_p3 }
   0xc   : > { %p105_p7 = scmp.eq.s32.totalorder %s1683_s16, 1  ;;  %p111_p8 = scmp.eq.s32.totalorder %s1304_s17, 1 }
   0xd   : > { %p1480_p10 = scmp.lt.s32.totalorder %s1629_s15, 2  ;;  %s137_s26 = sand.u32 1, %s1625_s14  }
   0xe   : > { %p1712_p11 = por %p105_p7, %p33_p0  ;;  %p1716_p12 = por %p111_p8, %p39_p3 }
   0xf   : > { %s1320_s27 = sshll.u32 %s1629_s15, 9  ;;  %s1307_s28 = sshll.u32 %s137_s26, 5 }
  0x10   : > { %s1870_s24 = scalar_select %p1712_p11, 1, 0 }
  0x11   : > { %s1871_s25 = scalar_select %p1716_p12, 1, 0 }
  0x12   : > { %s1725_s4 = scalar_lea.hbm %s1863_s0, %s1320_s27  ;;  %s141_s5 = scalar_lea.vmem [#allocation2], %s1307_s28 }
  0x13   : > { %s148_s6 = sshll.u32 %s141_s5, 4  ;;  %p1729_p13 = pnand %p1480_p10, %p1701_p5  ;;  %s1733_s6 = int_to_ptr.vmem [resolvable:$true] %s148_s6 }
  0x14   : > { %s1735_s8 = scalar_lea.sflag [#allocation3], %s137_s26  ;;  %s1533_s9 = scalar_lea.hbm %s1725_s4, 512 }
  0x15   : > { %p1534_p0 = scmp.ne.s32.totalorder %s1725_s4, %s1533_s9  ;;  %p1535_p1 = pneg %p1729_p13 }
  0x16   : > { %s1538_s17 = scalar_lea.hbm %s1863_s0, 1024  ;;  %p1539_p4 = scmp.lt.u32.totalorder %s1725_s4, %s1863_s0 }
  0x17   : > { %p1536_p2 = pnand %p1535_p1, %p1534_p0  ;;  %p1540_p5 = scmp.lt.u32.totalorder %s1538_s17, %s1533_s9 }
  0x18   : > { %p1542_p8 = scmp.lt.u32.totalorder %s1533_s9, %s1725_s4 }
  0x19   : > { %p1537_p3 = pneg %p1536_p2  ;;  %p1541_p7 = por %p1540_p5, %p1539_p4 }
  0x1b   : > { %p1543_p10 = por %p1542_p8, %p1541_p7 }
  0x1d   : > { %p1544_p9 = pnand %p1543_p10, %p1537_p3 }
  0x1f   : > { %1547 = shalt.err (!%p1544_p9)
}
  0x20   : > { %s1548_s22 = scalar_lea.vmem %s1733_s6, 512  ;;  %s1631_s26 = smov [#allocation2]  }
  0x21   : > { %p1549_p0 = scmp.ne.s32.totalorder %s1733_s6, %s1548_s22  ;;  %s1553_s27 = sshll.u32 %s1631_s26, 4  ;;  %s1554_s27 = int_to_ptr.vmem [resolvable:$false] %s1553_s27 }
  0x22   : > { %s1555_s28 = scalar_lea.vmem %s1554_s27, 1024  ;;  %p1556_p11 = scmp.lt.s32.totalorder %s1733_s6, %s1554_s27 }
  0x23   : > { %p1551_p2 = pnand %p1549_p0, %p1535_p1  ;;  %p1557_p4 = scmp.lt.s32.totalorder %s1555_s28, %s1548_s22 }
  0x25   : > { %p1552_p12 = pneg %p1551_p2  ;;  %p1558_p5 = por %p1557_p4, %p1556_p11 }
  0x27   : > { %p1559_p7 = pnand %p1558_p5, %p1552_p12 }
  0x29   : > { %1562 = shalt.err (!%p1559_p7)
}
  0x2a   : > { %s1632_s29 = smov 256   ;;  %s1633_s30 = smov 16  }
  0x2b   : > { %1475 = dma.hbm_to_vmem [thread:$0]  (!%p1729_p13), %s1725_s4, 512, %s1733_s6, %s1735_s8, %s1632_s29, %s1632_s29, %s1633_s30  }
  0x2c   : > { %p1310_p9 = scmp.ge.s32.totalorder %s1629_s15, 1  ;;  %p156_p1 = scmp.lt.s32.totalorder %s1629_s15, 3 }
  0x2e   : > { %p157_p3 = pnand %p1310_p9, %p156_p1 }
  0x2f   : > { %s1766_s5 = sand.u32 (!%p157_p3), 1, %s1621_s13  }
  0x30   : > { %160 = sbr.rel (%p157_p3) target bundleno = 1019 (0x3fb), region = 32  ;;  %s1311_s9 = sshll.u32 (!%p157_p3), %s1766_s5, 5 }
  0x31   : > { %s163_s10 = scalar_lea.sflag (!%p157_p3), [#allocation3], %s1766_s5  ;;  %s166_s11 = scalar_lea.vmem (!%p157_p3), [#allocation2], %s1311_s9 }
  0x37   : > { %1608 = dma.done.wait (%p1705_p6), %s163_s10, 512  }
  0x38   : > { %1610 = vsyncadd (%p1705_p6), %s163_s10, 4294966784  ;;  %v1776_v0 = vld [vmem:[%s166_s11] sm:$0xff]  ;;  %v1778_v1 = vld [vmem:[%s166_s11 + $0x8] sm:$0xff]  ;;  %v1634_v8 = vmov 0.0|0.0   ;;  %vm1635_vm0 = vmmov 0   ;;  %v1636_v9 = vmov 0.0  }
  0x39   : > { %v1780_v2 = vld [vmem:[%s166_s11 + $0x10] sm:$0xff]  ;;  %v193_v3 = vadd.f32 %v1778_v1, %v1776_v0  ;;  %v201_v4 = vmax.f32 %v1776_v0, %v1778_v1  ;;  %v1786_v5 = vld [vmem:[%s166_s11 + $0x18] sm:$0xff]  ;;  %1430 = vmatprep.subr.bf16.mxu0 %v1634_v8  ;;  %1362 = vmatprep.mubr.msk.f32.mxu0 %vm1635_vm0, %v1636_v9  ;;  %v210_v10 = vld [vmem:[%s1864_s1] sm:$0x3]  ;;  %vm213_vm1 = vcmask 130048   ;;  %vm207_vm2 = vcmask 7168  }
  0x3a   : > { %v196_v6 = vadd.f32 %v1786_v5, %v1780_v2  ;;  %v204_v7 = vmax.f32 %v1780_v2, %v1786_v5  ;;  %v215_v11 = vsel %vm213_vm1, %v210_v10, 0  ;;  %v211_v39 = vld [vmem:[%s1865_s2] sm:$0xff]  ;;  %vm677_vm3 = vcmask 15360   ;;  %v212_v46 = vld [vmem:[%s1865_s2 + $0x8] sm:$0xff]  ;;  %s1637_s19 = smov 127   ;;  %s188_s20 = scalar_lea.vmem [#allocation5], %s1311_s9 }
  0x3b   : > { %194 = vadd.xlane.f32.xlu0 %v193_v3  ;;  %202 = vmax.xlane.f32.xlu1 %v201_v4  ;;  %v284_v12 = vand.u32 4294901760, %v215_v11  ;;  %v679_v40 = vsel %vm677_vm3, %v211_v39, 0  ;;  %v682_v47 = vsel %vm677_vm3, %v212_v46, 0  ;;  %vm684_vm4 = vcmask 1041408   ;;  %s1231_s22 = sshll.u32 %s188_s20, 4  ;;  %s1321_s26 = sshll.u32 %s1683_s16, 9  ;;  %s1812_s22 = int_to_ptr.vmem [resolvable:$true] %s1231_s22 }
  0x3c   : > { %v754_v41 = vand.u32 4294901760, %v679_v40  ;;  %v764_v48 = vand.u32 4294901760, %v682_v47  ;;  %v1638_v3 = vmov 0   ;;  %s1817_s29 = scalar_lea.hbm %s1866_s3, %s1321_s26  ;;  %s1218_s16 = scalar_lea.sflag [#allocation4], %s1766_s5 }
  0x3d   : > { %v285_v13 = vsub.f32 %v215_v11, %v284_v12  ;;  %1523 = vset.pattern.permute.xlu1 %v1638_v3  ;;  %1524 = vset.pattern.permute.xlu0 %v1638_v3  ;;  %s1563_s30 = scalar_lea.vmem %s1812_s22, 512  ;;  %p1873_p11 = scmp.ne.s32.totalorder %s1870_s24, 0 }
  0x3e   : > { %v755_v42 = vsub.f32 %v679_v40, %v754_v41  ;;  %v765_v49 = vsub.f32 %v682_v47, %v764_v48  ;;  %p1564_p6 = scmp.ne.s32.totalorder %s1812_s22, %s1563_s30  ;;  %s1639_s9 = smov [#allocation5]  }
  0x3f   : > { %197 = vadd.xlane.f32.xlu0 %v196_v6  ;;  %205 = vmax.xlane.f32.xlu1 %v204_v7  ;;  %v286_v18 = vand.u32 4294901760, %v285_v13  ;;  %s1567_s10 = sshll.u32 %s1639_s9, 4  ;;  %s1568_s10 = int_to_ptr.vmem [resolvable:$false] %s1567_s10 }
  0x40   : > { %v756_v43 = vand.u32 4294901760, %v755_v42  ;;  %v766_v50 = vand.u32 4294901760, %v765_v49  ;;  %p1565_p12 = pnand %p1564_p6, %p1873_p11  ;;  %s1569_s11 = scalar_lea.vmem %s1568_s10, 1024 }
  0x41   : > { %v287_v25 = vsub.f32 %v285_v13, %v286_v18  ;;  %p1570_p8 = scmp.lt.s32.totalorder %s1812_s22, %s1568_s10  ;;  %p1571_p10 = scmp.lt.s32.totalorder %s1569_s11, %s1563_s30 }
  0x42   : > { %v757_v44 = vsub.f32 %v755_v42, %v756_v43  ;;  %v767_v52 = vsub.f32 %v765_v49, %v766_v50  ;;  %p1566_p13 = pneg %p1565_p12 }
  0x43   : > { %v288_v30 = vand.u32 4294901760, %v287_v25  ;;  %p1572_p0 = por %p1571_p10, %p1570_p8 }
  0x44   : > { %v758_v45 = vand.u32 4294901760, %v757_v44  ;;  %v768_v57 = vand.u32 4294901760, %v767_v52 }
  0x45   : > { %p1573_p2 = pnand %p1572_p0, %p1566_p13 }
  0x46   : > { %1402 = vmatprep.mubr.f32.mxu1 %v758_v45 }
  0xc8   : > { %v195_v14 = vpop.xlane.xlu0 %194  ;;  %v203_v15 = vpop.xlane.xlu1 %202 }
  0xc9   : > { %v199_v16 = vmul.f32 0.00390625, %v195_v14 }
  0xcb   : > { %v208_v17 = vsel %vm207_vm2, %v199_v16, %v203_v15 }
  0xcc   : > { %v218_v19 = vand.u32 4294901760, %v208_v17  ;;  %v198_v20 = vpop.xlane.xlu0 %197  ;;  %v206_v21 = vpop.xlane.xlu1 %205 }
  0xcd   : > { %v200_v22 = vmul.f32 0.00390625, %v198_v20 }
  0xce   : > { %v296_v23 = vsub.f32 %v208_v17, %v218_v19 }
  0xcf   : > { %v209_v24 = vsel %vm207_vm2, %v200_v22, %v206_v21 }
  0xd0   : > { %v297_v26 = vand.u32 4294901760, %v296_v23  ;;  %v221_v27 = vand.u32 4294901760, %v209_v24 }
  0xd2   : > { %v303_v28 = vsub.f32 %v209_v24, %v221_v27  ;;  %v1431_v29 = vpack.c.bf16 %v221_v27, %v218_v19  ;;  %v298_v31 = vsub.f32 %v296_v23, %v297_v26 }
  0xd4   : > { %v304_v32 = vand.u32 4294901760, %v303_v28  ;;  %1432 = vmatpush3.bf16.msra.mxu0 %v1431_v29  ;;  %v299_v34 = vand.u32 4294901760, %v298_v31  ;;  %v1437_v37 = vpack.c.bf16 %v303_v28, %v296_v23 }
  0xd5   : > { %1433 = vmatprep.subr.bf16.mxu0 %v1634_v8 }
  0xd6   : > { %v305_v33 = vsub.f32 %v303_v28, %v304_v32  ;;  %v1443_v38 = vpack.c.bf16 %v304_v32, %v297_v26 }
  0xd7   : > { %1363 = vmatmul.mubr.f32.vlgmr.msra.gmra.mrb[0].mxu0 %v288_v30 }
  0xd8   : > { %v306_v35 = vand.u32 4294901760, %v305_v33  ;;  %1369 = vmatprep.mubr.msk.f32.mxu0 %vm1635_vm0, %v1636_v9 }
  0xda   : > { %v1434_v36 = vpack.c.bf16 %v306_v35, %v299_v34 }
  0xdc   : > { %1435 = vmatpush3.bf16.msra.mxu0 %v1434_v36 }
  0xdd   : > { %1436 = vmatprep.subr.bf16.mxu0 %v1634_v8 }
  0xdf   : > { %1370 = vmatmul.mubr.f32.vlgmr.msra.gmra.mrb[0].mxu0 %v284_v12 }
  0xe0   : > { %1438 = vmatpush3.bf16.msra.mxu0 %v1437_v37  ;;  %1376 = vmatprep.mubr.msk.f32.mxu0 %vm1635_vm0, %v1636_v9 }
  0xe1   : > { %1439 = vmatprep.subr.bf16.mxu0 %v1634_v8 }
  0xe7   : > { %1377 = vmatmul.mubr.f32.vlgmr.msra.gmra.mrb[0].mxu0 %v285_v13 }
  0xe8   : > { %1441 = vmatpush3.bf16.msra.mxu0 %v1431_v29  ;;  %1383 = vmatprep.mubr.msk.f32.mxu0 %vm1635_vm0, %v1636_v9 }
  0xe9   : > { %1442 = vmatprep.subr.bf16.mxu0 %v1634_v8 }
  0xef   : > { %1384 = vmatmul.mubr.f32.vlgmr.msra.gmra.mrb[0].mxu0 %v286_v18 }
  0xf0   : > { %1444 = vmatpush3.bf16.msra.mxu0 %v1443_v38  ;;  %1390 = vmatprep.mubr.msk.f32.mxu0 %vm1635_vm0, %v1636_v9 }
  0xf1   : > { %1445 = vmatprep.subr.bf16.mxu0 %v1634_v8 }
  0xf7   : > { %1391 = vmatmul.mubr.f32.vlgmr.msra.gmra.mrb[0].mxu0 %v284_v12 }
  0xf8   : > { %1447 = vmatpush3.bf16.msra.mxu0 %v1431_v29  ;;  %1397 = vmatprep.mubr.msk.f32.mxu0 %vm1635_vm0, %v1636_v9 }
  0xff   : > { %1398 = vmatmul.mubr.f32.vlgmr.msra.gmra.mrb[0].mxu0 %v284_v12 }
 0x1d2   : > { %v672_v51 = vpop.f32.mrb[0].mxu0 }
 0x1d3   : > { %v676_v53 = vmax.f32 %v672_v51, 0.0  ;;  %v1399_v54 = vpop.f32.mrb[1].mxu0 }
 0x1d5   : > { %v686_v55 = vsel %vm684_vm4, %v676_v53, 0 }
 0x1d6   : > { %v689_v56 = vand.u32 4294901760, %v686_v55 }
 0x1d8   : > { %v776_v58 = vsub.f32 %v686_v55, %v689_v56  ;;  %1400 = vmatprep.subr.mxu1 %v689_v56 }
 0x1d9   : > { %1401 = vmatpush3.msra.mxu1 %v689_v56 }
 0x1da   : > { %1403 = vmatmul.mubr.f32.vlgmr.msra.gmra.mrb[0].mxu1 %v768_v57  ;;  %v777_v59 = vand.u32 4294901760, %v776_v58 }
 0x1db   : > { %1407 = vmatprep.mubr.f32.mxu1 %v754_v41 }
 0x1dc   : > { %v778_v60 = vsub.f32 %v776_v58, %v777_v59 }
 0x1de   : > { %v779_v61 = vand.u32 4294901760, %v778_v60 }
 0x1e0   : > { %1405 = vmatprep.subr.mxu1 %v779_v61 }
 0x1e1   : > { %1406 = vmatpush3.msra.mxu1 %v779_v61 }
 0x1e2   : > { %1408 = vmatmul.mubr.f32.vlgmr.msra.gmra.mrb[0].mxu1 %v764_v48  ;;  %1410 = vmatprep.subr.mxu1 %v776_v58 }
 0x1e3   : > { %1411 = vmatpush3.msra.mxu1 %v776_v58  ;;  %1412 = vmatprep.mubr.f32.mxu1 %v755_v42 }
 0x1e4   : > { %1415 = vmatprep.subr.mxu1 %v689_v56 }
 0x1ea   : > { %1413 = vmatmul.mubr.f32.vlgmr.msra.gmra.mrb[0].mxu1 %v765_v49 }
 0x1eb   : > { %1416 = vmatpush3.msra.mxu1 %v689_v56  ;;  %1417 = vmatprep.mubr.f32.mxu1 %v756_v43 }
 0x1ec   : > { %1420 = vmatprep.subr.mxu1 %v777_v59 }
 0x1f2   : > { %1418 = vmatmul.mubr.f32.vlgmr.msra.gmra.mrb[0].mxu1 %v766_v50 }
 0x1f3   : > { %1421 = vmatpush3.msra.mxu1 %v777_v59  ;;  %1422 = vmatprep.mubr.f32.mxu1 %v754_v41 }
 0x1f4   : > { %1425 = vmatprep.subr.mxu1 %v689_v56 }
 0x1fa   : > { %1423 = vmatmul.mubr.f32.vlgmr.msra.gmra.mrb[0].mxu1 %v764_v48 }
 0x1fb   : > { %1426 = vmatpush3.msra.mxu1 %v689_v56  ;;  %1427 = vmatprep.mubr.f32.mxu1 %v754_v41 }
 0x202   : > { %1428 = vmatmul.mubr.f32.vlgmr.msra.gmra.mrb[0].mxu1 %v764_v48 }
 0x2d5   : > { %v1429_v62 = vpop.f32.mrb[0].mxu1 }
 0x2d6   : > { %1181 = vrot.lane.b32.xlu1 %v1429_v62, %s1637_s19  ;;  %v1167_v63 = vpop.f32.mrb[1].mxu1 }
 0x2d7   : > { %1179 = vrot.lane.b32.xlu0 %v1167_v63, %s1637_s19 }
 0x348   : > { %v1182_v4 = vpop.permute.xlu1 %1181 }
 0x349   : > { %v1186_v6 = vadd.f32 %v1429_v62, %v1182_v4  ;;  %v1180_v7 = vpop.permute.xlu0 %1179 }
 0x34a   : > { %v1185_v8 = vadd.f32 %v1180_v7, %v1167_v63 }
 0x34b   : > { %v1314_v9 = vmul.f32 -1.442695, %v1186_v6 }
 0x34c   : > { %v1313_v10 = vmul.f32 -1.442695, %v1185_v8 }
 0x34d   : > { %1525 = vpow2.f32 %v1314_v9 }
 0x34e   : > { %1527 = vpow2.f32 %v1313_v10 }
 0x357   : > { %v1526_v11 = vpop.eup %1525 }
 0x358   : > { %v1528_v12 = vpop.eup %1527  ;;  %v1194_v14 = vadd.f32 1.0, %v1526_v11 }
 0x359   : > { %v1193_v13 = vadd.f32 1.0, %v1528_v12 }
 0x35b   : > { %1529 = vrcp.f32 %v1193_v13 }
 0x35c   : > { %1531 = vrcp.f32 %v1194_v14 }
 0x365   : > { %v1530_v15 = vpop.eup %1529 }
 0x366   : > { %1201 = vperm.xlu1 %1523, %v1530_v15   ;;  %v1532_v16 = vpop.eup %1531 }
 0x36a   : > { %1206 = vperm.xlu1 %1523, %v1532_v16  }
 0x3e5   : > { %v1202_v17 = vpop.permute.xlu1 %1201 }
 0x3e6   : > { %v1209_v18 = vmul.f32 %v1202_v17, %v1776_v0  ;;  %v1210_v19 = vmul.f32 %v1202_v17, %v1778_v1 }
 0x3e8   : > { %1213 = vst [vmem:[%s188_s20] sm:$0xff] %v1209_v18  ;;  %1214 = vst [vmem:[%s188_s20 + $0x8] sm:$0xff] %v1210_v19 }
 0x3e9   : > { %v1207_v20 = vpop.permute.xlu1 %1206 }
 0x3ea   : > { %v1211_v21 = vmul.f32 %v1207_v20, %v1780_v2  ;;  %v1212_v0 = vmul.f32 %v1207_v20, %v1786_v5 }
 0x3ec   : > { %1215 = vst [vmem:[%s188_s20 + $0x10] sm:$0xff] %v1211_v21  ;;  %1216 = vst [vmem:[%s188_s20 + $0x18] sm:$0xff] %v1212_v0 }
 0x3ed   : > { %1576 = shalt.err (!%p1573_p2)
}
 0x3ee   : > { %s1577_s23 = scalar_lea.hbm %s1817_s29, 512  ;;  %s1581_s7 = scalar_lea.hbm %s1866_s3, 1024 }
 0x3ef   : > { %p1578_p4 = scmp.ne.s32.totalorder %s1817_s29, %s1577_s23  ;;  %p1582_p9 = scmp.lt.u32.totalorder %s1817_s29, %s1866_s3 }
 0x3f0   : > { %p1583_p1 = scmp.lt.u32.totalorder %s1581_s7, %s1577_s23  ;;  %p1585_p6 = scmp.lt.u32.totalorder %s1577_s23, %s1817_s29 }
 0x3f1   : > { %p1579_p5 = pnand %p1578_p4, %p1873_p11 }
 0x3f2   : > { %p1584_p3 = por %p1583_p1, %p1582_p9 }
 0x3f3   : > { %p1580_p7 = pneg %p1579_p5 }
 0x3f4   : > { %p1586_p12 = por %p1585_p6, %p1584_p3 }
 0x3f6   : > { %p1587_p13 = pnand %p1586_p12, %p1580_p7 }
 0x3f8   : > { %1590 = shalt.err (!%p1587_p13)
}
 0x3f9   : > { %s1640_s19 = smov 256   ;;  %s1641_s20 = smov 16  }
 0x3fa   : > { %1470 = dma.vmem_to_hbm [thread:$0]  (%p1873_p11), %s1812_s22, 512, %s1817_s29, %s1218_s16, %s1640_s19, %s1640_s19, %s1641_s20  }
 0x3fb PF: > { %s1246_s26 = sand.u32 1, %s1617_s12   ;;  %p1874_p8 = scmp.ne.s32.totalorder %s1871_s25, 0 }
 0x3fc   : > { %p1875_p10 = scmp.ge.s32.totalorder %s1629_s15, 2  ;;  %s1247_s27 = scalar_lea.sflag [#allocation4], %s1246_s26 }
 0x3fe   : > { %p1477_p0 = pnand %p1875_p10, %p1874_p8 }
 0x400   : > { %1612 = dma.done.wait (!%p1477_p0), %s1247_s27, 512  }
 0x401   : > { %1614 = vsyncadd (!%p1477_p0), %s1247_s27, 4294966784  ;;  %p16_p2 = scmp.ge.s32.totalorder %s1687_s18, 4   ;;  %s1876_s12 = smov %s1621_s13 }
 0x402   : > { %s1877_s13 = smov %s1625_s14  ;;  %s1878_s14 = smov %s1699_s21 }
 0x403   : > { %s1879_s15 = smov %s1687_s18  ;;  %18 = sbr.rel (!%p16_p2) target bundleno = 5 (0x5), region = 77 }
 0x40a   :  { %1252 = vsyncpa [#allocation3], 1 }
 0x40b   :  { %1254 = vsyncpa [#allocation3 + $0x1], 1 }
 0x40c   :  { %1255 = vsyncpa [#allocation4], 1 }
 0x40d   :  { %1257 = vsyncpa [#allocation4 + $0x1], 1 }

</bundles_post_ra>
